<compile_context>
chip_gen: v7x
topology: tpu7x:2x2x1
jax: 0.10.0
libtpu: 0.0.40
codegen_flags: <defaults>
</compile_context>

<pallas_src>
import math

import jax
import jax.numpy as jnp
from jax.experimental import pallas as pl
from jax.experimental.pallas import tpu as pltpu


# ----------------------------------------------------------------------------
# Kernels
# ----------------------------------------------------------------------------

def scse_fused_kernel(x_ref, wsq_ref, w1_ref, b1_ref, w2_ref, b2_ref, o_ref):
    """Single-pass SCse. Block = (NB, C, HW); one read of x produces the output."""
    x = x_ref[...].astype(jnp.float32)                                  # (NB, C, HW)

    # Spatial gate: sigmoid(sum_c x[c, p] * wsq[c]) -- VPU mul + sublane reduce.
    s = jax.nn.sigmoid(
        jnp.sum(x * wsq_ref[...][None, :, :], axis=1, keepdims=True))   # (NB, 1, HW)

    # Channel gate: GAP over lanes, then the two tiny 1x1-conv contractions done
    # as broadcast-mul + sublane reduce (a few KB of data; no MXU needed).
    z = jnp.mean(x, axis=2)                                              # (NB, C)
    h = jnp.sum(z[:, :, None] * w1_ref[...][None, :, :], axis=1) + b1_ref[...]
    h = jnp.maximum(h, 0.0)                                              # (NB, Cr)
    g = jnp.sum(h[:, :, None] * w2_ref[...][None, :, :], axis=1) + b2_ref[...]
    g = jax.nn.sigmoid(g)[:, :, None]                                    # (NB, C, 1)

    # satt + catt = x*s + x*g = x*(s + g): 2 VPU ops/element, no temporaries kept.
    o_ref[...] = (x * (s + g)).astype(o_ref.dtype)


def scse_spatial_kernel(x_ref, wsq_ref, g_ref, o_ref):
    """Two-pass fallback (huge HW): channel gate g precomputed, spatial axis tiled."""
    x = x_ref[0].astype(jnp.float32)                                     # (C, T_HW)
    s = jax.nn.sigmoid(jnp.sum(x * wsq_ref[...], axis=0, keepdims=True))  # (1, T_HW)
    g = g_ref[0].astype(jnp.float32)                                     # (C, 1)
    o_ref[0] = (x * (s + g)).astype(o_ref.dtype)


# ----------------------------------------------------------------------------
# Generation-aware sizing
# ----------------------------------------------------------------------------

def _vmem_budget_bytes():
    """Scoped-VMEM budget derived from the actual chip (v7x: 64 MiB physical)."""
    try:
        cap = int(pltpu.get_tpu_info().vmem_capacity_bytes)
    except Exception:
        cap = 64 * 1024 * 1024            # assume the smallest (v7x) if unknown
    return min(cap // 2, 48 * 1024 * 1024)


def _choose_batch_block(n, slab_bytes, block_cap_bytes):
    """NB batch elements per grid step: fat blocks, but >= min(N, 4) grid steps."""
    nb_by_bytes = max(1, block_cap_bytes // max(1, slab_bytes))
    nb_by_steps = max(1, n // min(n, 4))
    return max(1, min(n, nb_by_bytes, nb_by_steps))


def _choose_hw_tile(hw, c, itemsize, block_cap_bytes, n):
    """Lane-dense spatial tile for the two-pass fallback; keeps >= 4 grid steps."""
    if hw <= 128:
        return hw
    max_lanes = max(128, (block_cap_bytes // max(1, c * itemsize)) // 128 * 128)
    t = hw if hw <= max_lanes else max_lanes
    while t > 128 and n * pl.cdiv(hw, t) < 4:
        t = max(128, ((t // 2) // 128) * 128)
    return t


# ----------------------------------------------------------------------------
# Wrapper
# ----------------------------------------------------------------------------

def scse_forward(x_nchw, wsq, w1, b1, w2, b2, *, force_two_pass=False):
    """SCse forward: satt(x) + catt(x) on NCHW input.

    wsq: (C, 1)   squeeze conv weight (Conv2d(C, 1, 1, bias=False))
    w1:  (C, Cr)  GAB.conv1 weight (right-matmul layout), b1: (1, Cr)
    w2:  (Cr, C)  GAB.conv2 weight (right-matmul layout), b2: (1, C)
    """
    N, C, H, W = x_nchw.shape
    HW = H * W
    x = x_nchw.reshape(N, C, HW)                     # free reshape, no transpose

    itemsize = x.dtype.itemsize
    budget = _vmem_budget_bytes()
    # Raw per-step block cap: in+out double-buffered plus f32 in-kernel temps
    # => keep the raw block at <= budget/10 (~3-5 MiB depending on generation).
    block_cap = max(128 * C * itemsize, budget // 10)
    slab_bytes = C * HW * itemsize

    wsq_f = wsq.astype(jnp.float32)

    if (not force_two_pass) and slab_bytes <= block_cap:
        # ---- Single-pass fused kernel: one HBM read + one HBM write of x. ----
        nb = _choose_batch_block(N, slab_bytes, block_cap)
        grid = (pl.cdiv(N, nb),)
        out = pl.pallas_call(
            scse_fused_kernel,
            out_shape=jax.ShapeDtypeStruct((N, C, HW), x.dtype),
            grid=grid,
            in_specs=[
                pl.BlockSpec((nb, C, HW), lambda n: (n, 0, 0)),
                pl.BlockSpec(wsq_f.shape, lambda n: (0, 0)),
                pl.BlockSpec(w1.shape, lambda n: (0, 0)),
                pl.BlockSpec(b1.shape, lambda n: (0, 0)),
                pl.BlockSpec(w2.shape, lambda n: (0, 0)),
                pl.BlockSpec(b2.shape, lambda n: (0, 0)),
            ],
            out_specs=pl.BlockSpec((nb, C, HW), lambda n: (n, 0, 0)),
            compiler_params=pltpu.CompilerParams(
                dimension_semantics=("parallel",),
                vmem_limit_bytes=budget,
            ),
        )(x, wsq_f,
          w1.astype(jnp.float32), b1.astype(jnp.float32),
          w2.astype(jnp.float32), b2.astype(jnp.float32))
    else:
        # ---- Two-pass fallback for very large HW. ----
        # dtype=f32 on the mean so the upcast fuses into the reduce (no f32 copy
        # of a low-precision x in HBM).
        z = jnp.mean(x, axis=2, dtype=jnp.float32)                        # (N, C)
        h = jnp.maximum(z @ w1.astype(jnp.float32) + b1.astype(jnp.float32), 0.0)
        g = jax.nn.sigmoid(h @ w2.astype(jnp.float32) + b2.astype(jnp.float32))
        g = g[:, :, None].astype(jnp.float32)                             # (N, C, 1)

        t_hw = _choose_hw_tile(HW, C, itemsize, block_cap, N)
        grid = (N, pl.cdiv(HW, t_hw))
        out = pl.pallas_call(
            scse_spatial_kernel,
            out_shape=jax.ShapeDtypeStruct((N, C, HW), x.dtype),
            grid=grid,
            in_specs=[
                pl.BlockSpec((1, C, t_hw), lambda n, t: (n, 0, t)),
                pl.BlockSpec(wsq_f.shape, lambda n, t: (0, 0)),
                pl.BlockSpec((1, C, 1), lambda n, t: (n, 0, 0)),
            ],
            out_specs=pl.BlockSpec((1, C, t_hw), lambda n, t: (n, 0, t)),
            compiler_params=pltpu.CompilerParams(
                dimension_semantics=("parallel", "parallel"),
                vmem_limit_bytes=budget,
            ),
        )(x, wsq_f, g)

    return out.reshape(N, C, H, W)


# ----------------------------------------------------------------------------
# Reference + test
# ----------------------------------------------------------------------------

def _xavier_uniform(key, fan_in, fan_out, shape):
    limit = math.sqrt(6.0 / (fan_in + fan_out))
    return jax.random.uniform(key, shape, jnp.float32, minval=-limit, maxval=limit)


def _reference(x_nchw, wsq, w1, b1, w2, b2):
    # Plain-JAX reference matching the PyTorch forward semantics (NCHW).
    xf = x_nchw.astype(jnp.float32)
    s = jax.nn.sigmoid(jnp.einsum("nchw,c->nhw", xf, wsq[:, 0]))[:, None]   # (N,1,H,W)
    satt = xf * s
    z = jnp.mean(xf, axis=(2, 3))                                           # (N, C)
    h = jnp.maximum(z @ w1 + b1, 0.0)
    g = jax.nn.sigmoid(h @ w2 + b2)                                         # (N, C)
    catt = xf * g[:, :, None, None]
    return satt + catt


if __name__ == "__main__":
    N, C, H, W = 2, 8, 16, 16
    reduction = 4
    Cr = C // reduction

    key = jax.random.PRNGKey(0)
    kx, k1, k2, k3, k4, k5 = jax.random.split(key, 6)

    x = jax.random.normal(kx, (N, C, H, W), jnp.float32)

    # SpatialAttention2d2.squeeze: Conv2d(C, 1, 1, bias=False), xavier_uniform
    wsq = _xavier_uniform(k1, fan_in=C, fan_out=1, shape=(C, 1))
    # GAB.conv1: Conv2d(C, C//r, 1), xavier_uniform weight + default uniform bias
    w1 = _xavier_uniform(k2, fan_in=C, fan_out=Cr, shape=(C, Cr))
    b1 = jax.random.uniform(k3, (1, Cr), jnp.float32,
                            minval=-1.0 / math.sqrt(C), maxval=1.0 / math.sqrt(C))
    # GAB.conv2: Conv2d(C//r, C, 1), xavier_uniform weight + default uniform bias
    w2 = _xavier_uniform(k4, fan_in=Cr, fan_out=C, shape=(Cr, C))
    b2 = jax.random.uniform(k5, (1, C), jnp.float32,
                            minval=-1.0 / math.sqrt(Cr), maxval=1.0 / math.sqrt(Cr))

    ref = _reference(x, wsq, w1, b1, w2, b2)

    # Single-pass fused path (default for this shape).
    out = jax.block_until_ready(scse_forward(x, wsq, w1, b1, w2, b2))
    assert out.shape == (N, C, H, W)
    assert jnp.allclose(out, ref, atol=1e-5, rtol=1e-5)

    # Also exercise the two-pass (large-HW) fallback path once.
    out2 = jax.block_until_ready(
        scse_forward(x, wsq, w1, b1, w2, b2, force_two_pass=True))
    assert jnp.allclose(out2, ref, atol=1e-5, rtol=1e-5)

    print("KERNEL_OK")
</pallas_src>

<mosaic_0001>
module attributes {stable_mosaic.version = 11 : i64} {
  func.func @scse_fused_kernel(%arg0: i32, %arg1: memref<1x8x256xf32, #tpu.memory_space<vmem>>, %arg2: memref<8x1xf32, #tpu.memory_space<vmem>>, %arg3: memref<8x2xf32, #tpu.memory_space<vmem>>, %arg4: memref<1x2xf32, #tpu.memory_space<vmem>>, %arg5: memref<2x8xf32, #tpu.memory_space<vmem>>, %arg6: memref<1x8xf32, #tpu.memory_space<vmem>>, %arg7: memref<1x8x256xf32, #tpu.memory_space<vmem>>) attributes {dimension_semantics = [#tpu.dimension_semantics<parallel>], iteration_bounds = array<i64: 2>, scalar_prefetch = 0 : i64, scratch_operands = 0 : i64, tpu.core_type = #tpu.core_type<tc>, window_params = [{transform_indices = @transform_0, window_bounds = array<i64: 1, 8, 256>}, {pipeline_mode = #tpu.pipeline_mode<synchronous>, transform_indices = @transform_1, window_bounds = array<i64: 8, 1>}, {pipeline_mode = #tpu.pipeline_mode<synchronous>, transform_indices = @transform_2, window_bounds = array<i64: 8, 2>}, {pipeline_mode = #tpu.pipeline_mode<synchronous>, transform_indices = @transform_3, window_bounds = array<i64: 1, 2>}, {pipeline_mode = #tpu.pipeline_mode<synchronous>, transform_indices = @transform_4, window_bounds = array<i64: 2, 8>}, {pipeline_mode = #tpu.pipeline_mode<synchronous>, transform_indices = @transform_5, window_bounds = array<i64: 1, 8>}, {transform_indices = @transform_6, window_bounds = array<i64: 1, 8, 256>}]} {
    %c0 = arith.constant 0 : index
    %c0_0 = arith.constant 0 : index
    %c0_1 = arith.constant 0 : index
    %0 = vector.load %arg1[%c0, %c0_0, %c0_1] : memref<1x8x256xf32, #tpu.memory_space<vmem>>, vector<1x8x256xf32>
    %c0_2 = arith.constant 0 : index
    %c0_3 = arith.constant 0 : index
    %1 = vector.load %arg2[%c0_2, %c0_3] : memref<8x1xf32, #tpu.memory_space<vmem>>, vector<8x1xf32>
    %2 = vector.shape_cast %1 : vector<8x1xf32> to vector<1x8x1xf32>
    %3 = vector.broadcast %2 : vector<1x8x1xf32> to vector<1x8x256xf32>
    %4 = arith.mulf %0, %3 : vector<1x8x256xf32>
    %cst = arith.constant dense<0.000000e+00> : vector<1x256xf32>
    %5 = vector.multi_reduction <add>, %4, %cst [1] : vector<1x8x256xf32> to vector<1x256xf32>
    %6 = vector.shape_cast %5 : vector<1x256xf32> to vector<1x1x256xf32>
    %7 = arith.negf %6 : vector<1x1x256xf32>
    %8 = math.exp %7 : vector<1x1x256xf32>
    %cst_4 = arith.constant 1.000000e+00 : f32
    %9 = vector.broadcast %cst_4 : f32 to vector<1x1x256xf32>
    %10 = arith.addf %9, %8 : vector<1x1x256xf32>
    %11 = arith.divf %9, %10 : vector<1x1x256xf32>
    %cst_5 = arith.constant dense<0.000000e+00> : vector<1x8xf32>
    %12 = vector.multi_reduction <add>, %0, %cst_5 [2] : vector<1x8x256xf32> to vector<1x8xf32>
    %cst_6 = arith.constant 2.560000e+02 : f32
    %13 = vector.broadcast %cst_6 : f32 to vector<1x8xf32>
    %14 = arith.divf %12, %13 : vector<1x8xf32>
    %15 = vector.shape_cast %14 : vector<1x8xf32> to vector<1x8x1xf32>
    %c0_7 = arith.constant 0 : index
    %c0_8 = arith.constant 0 : index
    %16 = vector.load %arg3[%c0_7, %c0_8] : memref<8x2xf32, #tpu.memory_space<vmem>>, vector<8x2xf32>
    %17 = vector.shape_cast %16 : vector<8x2xf32> to vector<1x8x2xf32>
    %18 = vector.broadcast %15 : vector<1x8x1xf32> to vector<1x8x2xf32>
    %19 = arith.mulf %18, %17 : vector<1x8x2xf32>
    %cst_9 = arith.constant dense<0.000000e+00> : vector<1x2xf32>
    %20 = vector.multi_reduction <add>, %19, %cst_9 [1] : vector<1x8x2xf32> to vector<1x2xf32>
    %c0_10 = arith.constant 0 : index
    %c0_11 = arith.constant 0 : index
    %21 = vector.load %arg4[%c0_10, %c0_11] : memref<1x2xf32, #tpu.memory_space<vmem>>, vector<1x2xf32>
    %22 = arith.addf %20, %21 : vector<1x2xf32>
    %cst_12 = arith.constant 0.000000e+00 : f32
    %23 = vector.broadcast %cst_12 : f32 to vector<1x2xf32>
    %24 = arith.maximumf %22, %23 : vector<1x2xf32>
    %25 = vector.shape_cast %24 : vector<1x2xf32> to vector<1x2x1xf32>
    %c0_13 = arith.constant 0 : index
    %c0_14 = arith.constant 0 : index
    %26 = vector.load %arg5[%c0_13, %c0_14] : memref<2x8xf32, #tpu.memory_space<vmem>>, vector<2x8xf32>
    %27 = vector.shape_cast %26 : vector<2x8xf32> to vector<1x2x8xf32>
    %28 = vector.broadcast %25 : vector<1x2x1xf32> to vector<1x2x8xf32>
    %29 = arith.mulf %28, %27 : vector<1x2x8xf32>
    %cst_15 = arith.constant dense<0.000000e+00> : vector<1x8xf32>
    %30 = vector.multi_reduction <add>, %29, %cst_15 [1] : vector<1x2x8xf32> to vector<1x8xf32>
    %c0_16 = arith.constant 0 : index
    %c0_17 = arith.constant 0 : index
    %31 = vector.load %arg6[%c0_16, %c0_17] : memref<1x8xf32, #tpu.memory_space<vmem>>, vector<1x8xf32>
    %32 = arith.addf %30, %31 : vector<1x8xf32>
    %33 = arith.negf %32 : vector<1x8xf32>
    %34 = math.exp %33 : vector<1x8xf32>
    %cst_18 = arith.constant 1.000000e+00 : f32
    %35 = vector.broadcast %cst_18 : f32 to vector<1x8xf32>
    %36 = arith.addf %35, %34 : vector<1x8xf32>
    %37 = arith.divf %35, %36 : vector<1x8xf32>
    %38 = vector.shape_cast %37 : vector<1x8xf32> to vector<1x8x1xf32>
    %39 = vector.broadcast %11 : vector<1x1x256xf32> to vector<1x8x256xf32>
    %40 = vector.broadcast %38 : vector<1x8x1xf32> to vector<1x8x256xf32>
    %41 = arith.addf %39, %40 : vector<1x8x256xf32>
    %42 = arith.mulf %0, %41 : vector<1x8x256xf32>
    %c0_19 = arith.constant 0 : index
    %c0_20 = arith.constant 0 : index
    %c0_21 = arith.constant 0 : index
    %43 = vector.load %arg7[%c0_19, %c0_20, %c0_21] : memref<1x8x256xf32, #tpu.memory_space<vmem>>, vector<1x8x256xf32>
    tpu.vector_store %arg7[%c0_19, %c0_20, %c0_21], %42 {strides = array<i32>} : memref<1x8x256xf32, #tpu.memory_space<vmem>>, vector<1x8x256xf32>,
    return
  }
  func.func @transform_0(%arg0: i32) -> (i32, i32, i32) {
    %c0_i32 = arith.constant 0 : i32
    %c0_i32_0 = arith.constant 0 : i32
    %c0_i32_1 = arith.constant 0 : i32
    return %arg0, %c0_i32, %c0_i32_0 : i32, i32, i32
  }
  func.func @transform_1(%arg0: i32) -> (i32, i32) {
    %c0_i32 = arith.constant 0 : i32
    %c0_i32_0 = arith.constant 0 : i32
    %c0_i32_1 = arith.constant 0 : i32
    return %c0_i32, %c0_i32_0 : i32, i32
  }
  func.func @transform_2(%arg0: i32) -> (i32, i32) {
    %c0_i32 = arith.constant 0 : i32
    %c0_i32_0 = arith.constant 0 : i32
    %c0_i32_1 = arith.constant 0 : i32
    return %c0_i32, %c0_i32_0 : i32, i32
  }
  func.func @transform_3(%arg0: i32) -> (i32, i32) {
    %c0_i32 = arith.constant 0 : i32
    %c0_i32_0 = arith.constant 0 : i32
    %c0_i32_1 = arith.constant 0 : i32
    return %c0_i32, %c0_i32_0 : i32, i32
  }
  func.func @transform_4(%arg0: i32) -> (i32, i32) {
    %c0_i32 = arith.constant 0 : i32
    %c0_i32_0 = arith.constant 0 : i32
    %c0_i32_1 = arith.constant 0 : i32
    return %c0_i32, %c0_i32_0 : i32, i32
  }
  func.func @transform_5(%arg0: i32) -> (i32, i32) {
    %c0_i32 = arith.constant 0 : i32
    %c0_i32_0 = arith.constant 0 : i32
    %c0_i32_1 = arith.constant 0 : i32
    return %c0_i32, %c0_i32_0 : i32, i32
  }
  func.func @transform_6(%arg0: i32) -> (i32, i32, i32) {
    %c0_i32 = arith.constant 0 : i32
    %c0_i32_0 = arith.constant 0 : i32
    %c0_i32_1 = arith.constant 0 : i32
    return %arg0, %c0_i32, %c0_i32_0 : i32, i32, i32
  }
}

</mosaic_0001>

<bundles_post_ra>
// kernel: tpu_custom_call.1
= control target key start
LH: loop header
LB: loop body
LE: loop exit
PB: predicated region body
PF: predicated region fallthrough
CT: control target
= control target key end

     0   :  { %11 = vsyncpa [#allocation3], 0  ;;  %s849_s0 = inlined_call_operand.hbm [shape: f32[2,8,256], index: 0, kind: input, shape index: {}]   ;;  %s850_s1 = inlined_call_operand.vmem [shape: f32[8,1], index: 1, kind: input, shape index: {}]   ;;  %s851_s2 = inlined_call_operand.vmem [shape: f32[8,2], index: 2, kind: input, shape index: {}]   ;;  %s852_s3 = inlined_call_operand.vmem [shape: f32[1,2], index: 3, kind: input, shape index: {}]   ;;  %s853_s4 = inlined_call_operand.vmem [shape: f32[2,8], index: 4, kind: input, shape index: {}]   ;;  %s854_s5 = inlined_call_operand.vmem [shape: f32[1,8], index: 5, kind: input, shape index: {}]   ;;  %s855_s6 = inlined_call_operand.hbm [shape: f32[2,8,256], index: 6, kind: output, shape index: {}]  }
   0x1   :  { %13 = vsyncpa [#allocation3 + $0x1], 0 }
   0x2   :  { %14 = vsyncpa [#allocation4], 0 }
   0x3   :  { %16 = vsyncpa [#allocation4 + $0x1], 0  ;;  %s659_s21 = smov 0   ;;  %s661_s22 = smov 0  }
   0x4   :  { %s663_s23 = smov 0   ;;  %s665_s24 = smov 0  }
   0x5 LB: > { %s680_s25 = sadd.s32 4294967295, %s619_s24   ;;  %s443_s26 = sadd.s32 4294967294, %s619_s24   ;;  %s619_s24 = sphi %s665_s24, %s870_s24   ;;  %s615_s23 = sphi %s663_s23, %s869_s23   ;;  %s611_s22 = sphi %s661_s22, %s868_s22   ;;  %s607_s21 = sphi %s659_s21, %s867_s21  }
   0x6   : > { %s684_s27 = sadd.s32 1, %s619_s24   ;;  %s29_s28 = sadd.s32 1, %s615_s23 }
   0x7   : > { %s26_s29 = ssub.s32 %s619_s24, %s684_s27  ;;  %p36_p0 = scmp.ne.s32.totalorder %s615_s23, %s611_s22 }
   0x8   : > { %p27_p1 = scmp.eq.s32.totalorder %s26_s29, 0  ;;  %p37_p2 = scmp.eq.s32.totalorder %s619_s24, 0 }
   0x9   : > { %p42_p3 = scmp.ne.s32.totalorder %s611_s22, %s607_s21  ;;  %p43_p4 = scmp.eq.s32.totalorder %s680_s25, 0 }
   0xa   : > { %s696_s30 = scalar_select %p27_p1, %s615_s23, %s29_s28  }
   0xb   : > { %p698_p5 = por %p37_p2, %p36_p0  ;;  %p702_p6 = por %p43_p4, %p42_p3 }
   0xc   : > { %p171_p7 = scmp.eq.s32.totalorder %s680_s25, 1  ;;  %p177_p8 = scmp.eq.s32.totalorder %s443_s26, 1 }
   0xd   : > { %p474_p10 = scmp.lt.s32.totalorder %s619_s24, 2  ;;  %s212_s11 = sand.u32 1, %s615_s23  }
   0xe   : > { %p709_p11 = por %p171_p7, %p36_p0  ;;  %p713_p12 = por %p177_p8, %p42_p3 }
   0xf   : > { %s460_s12 = sshll.u32 %s619_s24, 8  ;;  %s446_s13 = sshll.u32 %s212_s11, 4 }
  0x10   : > { %s859_s9 = scalar_select %p709_p11, 1, 0 }
  0x11   : > { %s860_s10 = scalar_select %p713_p12, 1, 0 }
  0x12   : > { %s722_s16 = scalar_lea.hbm %s849_s0, %s460_s12  ;;  %s216_s17 = scalar_lea.vmem [#allocation2], %s446_s13 }
  0x13   : > { %s224_s18 = sshll.u32 %s216_s17, 4  ;;  %p726_p13 = pnand %p474_p10, %p698_p5  ;;  %s730_s18 = int_to_ptr.vmem [resolvable:$true] %s224_s18 }
  0x14   : > { %s213_s20 = scalar_lea.sflag [#allocation3], %s212_s11  ;;  %s523_s26 = scalar_lea.hbm %s722_s16, 256 }
  0x15   : > { %p524_p2 = scmp.ne.s32.totalorder %s722_s16, %s523_s26  ;;  %p525_p3 = pneg %p726_p13 }
  0x16   : > { %s528_s7 = scalar_lea.hbm %s849_s0, 512  ;;  %p529_p5 = scmp.lt.u32.totalorder %s722_s16, %s849_s0 }
  0x17   : > { %p526_p4 = pnand %p525_p3, %p524_p2  ;;  %p530_p8 = scmp.lt.u32.totalorder %s528_s7, %s523_s26 }
  0x18   : > { %p532_p9 = scmp.lt.u32.totalorder %s523_s26, %s722_s16 }
  0x19   : > { %p527_p7 = pneg %p526_p4  ;;  %p531_p10 = por %p530_p8, %p529_p5 }
  0x1b   : > { %p533_p0 = por %p532_p9, %p531_p10 }
  0x1d   : > { %p534_p1 = pnand %p533_p0, %p527_p7 }
  0x1f   : > { %537 = shalt.err (!%p534_p1)
}
  0x20   : > { %s538_s11 = scalar_lea.vmem %s730_s18, 256  ;;  %s621_s14 = smov [#allocation2]  }
  0x21   : > { %p539_p2 = scmp.ne.s32.totalorder %s730_s18, %s538_s11  ;;  %s543_s15 = sshll.u32 %s621_s14, 4  ;;  %s544_s15 = int_to_ptr.vmem [resolvable:$false] %s543_s15 }
  0x22   : > { %s545_s17 = scalar_lea.vmem %s544_s15, 512  ;;  %p546_p11 = scmp.lt.s32.totalorder %s730_s18, %s544_s15 }
  0x23   : > { %p541_p4 = pnand %p539_p2, %p525_p3  ;;  %p547_p5 = scmp.lt.s32.totalorder %s545_s17, %s538_s11 }
  0x25   : > { %p542_p12 = pneg %p541_p4  ;;  %p548_p8 = por %p547_p5, %p546_p11 }
  0x27   : > { %p549_p9 = pnand %p548_p8, %p542_p12 }
  0x29   : > { %552 = shalt.err (!%p549_p9)
}
  0x2a   : > { %469 = dma.hbm_to_vmem [thread:$0]  (!%p726_p13), %s722_s16, 256, %s730_s18, %s213_s20  }
  0x2b   : > { %p862_p0 = scmp.lt.s32.totalorder %s619_s24, 3  ;;  %p863_p1 = scmp.ge.s32.totalorder %s619_s24, 1 }
  0x2d   : > { %p230_p3 = pnand %p863_p1, %p862_p0 }
  0x2e   : > { %s764_s26 = sand.u32 (!%p230_p3), 1, %s611_s22  }
  0x2f   : > { %233 = sbr.rel (%p230_p3) target bundleno = 516 (0x204), region = 44  ;;  %s450_s28 = sshll.u32 (!%p230_p3), %s764_s26, 4 }
  0x30   : > { %s236_s29 = scalar_lea.sflag (!%p230_p3), [#allocation3], %s764_s26  ;;  %s239_s19 = scalar_lea.vmem (!%p230_p3), [#allocation2], %s450_s28 }
  0x36   : > { %598 = dma.done.wait (%p702_p6), %s236_s29, 256  }
  0x37   : > { %600 = vsyncadd (%p702_p6), %s236_s29, 4294967040  ;;  %v774_v0 = vld [vmem:[%s239_s19] sm:$0xff]  ;;  %v776_v1 = vld [vmem:[%s239_s19 + $0x8] sm:$0xff]  ;;  %v622_v4 = vmov 0   ;;  %vm309_vm0 = vcmask 15360   ;;  %v320_v13 = vlaneseq  ;;  %vm329_vm1 = vcmask 58368  }
  0x38   : > { %v302_v2 = vadd.f32 %v776_v1, %v774_v0  ;;  %v270_v3 = vld [vmem:[%s850_s1] sm:$0xff]  ;;  %509 = vset.pattern.permute.xlu1 %v622_v4  ;;  %510 = vset.pattern.permute.xlu0 %v622_v4  ;;  %s461_s17 = sshll.u32 %s680_s25, 8  ;;  %s267_s29 = scalar_lea.vmem [#allocation5], %s450_s28 }
  0x39   : > { %273 = vperm.xlu1 %509, %v270_v3   ;;  %v307_v5 = vld [vmem:[%s851_s2] sm:$0xff]  ;;  %v321_v16 = vshrl.u32 %v320_v13, 7  ;;  %s373_s19 = sshll.u32 %s267_s29, 4  ;;  %s805_s20 = scalar_lea.hbm %s855_s6, %s461_s17  ;;  %s807_s19 = int_to_ptr.vmem [resolvable:$true] %s373_s19 }
  0x3a   : > { %303 = vadd.xlane.f32.xlu0 %v302_v2  ;;  %v317_v17 = vld [vmem:[%s852_s3] sm:$0x1]  ;;  %s359_s25 = scalar_lea.sflag [#allocation4], %s764_s26  ;;  %s553_s28 = scalar_lea.vmem %s807_s19, 256 }
  0x3b   : > { %v322_v20 = vsub.s32 0, %v321_v16  ;;  %v327_v23 = vld [vmem:[%s853_s4] sm:$0x3]  ;;  %p554_p6 = scmp.ne.s32.totalorder %s807_s19, %s553_s28  ;;  %p864_p11 = scmp.ne.s32.totalorder %s859_s9, 0 }
  0x3c   : > { %v337_v32 = vld [vmem:[%s854_s5] sm:$0x1]  ;;  %s623_s7 = smov [#allocation5]  }
  0x3d   : > { %p555_p12 = pnand %p554_p6, %p864_p11  ;;  %s557_s8 = sshll.u32 %s623_s7, 4  ;;  %s558_s8 = int_to_ptr.vmem [resolvable:$false] %s557_s8 }
  0x3e   : > { %s559_s12 = scalar_lea.vmem %s558_s8, 512  ;;  %p560_p7 = scmp.lt.s32.totalorder %s807_s19, %s558_s8 }
  0x3f   : > { %p556_p13 = pneg %p555_p12  ;;  %p561_p10 = scmp.lt.s32.totalorder %s559_s12, %s553_s28 }
  0x41   : > { %p562_p2 = por %p561_p10, %p560_p7 }
  0x43   : > { %p563_p4 = pnand %p562_p2, %p556_p13 }
  0xb8   : > { %v274_v40 = vpop.permute.xlu1 %273 }
  0xb9   : > { %v277_v41 = vmul.f32 %v274_v40, %v776_v1  ;;  %v276_v42 = vmul.f32 %v274_v40, %v774_v0 }
  0xbb   : > { %v284_v43 = vrot.slane %v277_v41, 4  ;;  %v278_v44 = vrot.slane %v276_v42, 4 }
  0xbd   : > { %v285_v45 = vadd.f32 %v284_v43, %v277_v41  ;;  %v279_v46 = vadd.f32 %v278_v44, %v276_v42 }
  0xbf   : > { %v286_v47 = vrot.slane %v285_v45, 2  ;;  %v280_v48 = vrot.slane %v279_v46, 2 }
  0xc1   : > { %v287_v49 = vadd.f32 %v286_v47, %v285_v45  ;;  %v281_v50 = vadd.f32 %v280_v48, %v279_v46 }
  0xc3   : > { %v288_v51 = vrot.slane %v287_v49, 1  ;;  %v282_v52 = vrot.slane %v281_v50, 1 }
  0xc5   : > { %v289_v53 = vadd.f32 %v288_v51, %v287_v49  ;;  %v283_v54 = vadd.f32 %v282_v52, %v281_v50 }
  0xc7   : > { %v304_v6 = vpop.xlane.xlu0 %303  ;;  %v453_v55 = vmul.f32 -1.442695, %v289_v53  ;;  %v452_v56 = vmul.f32 -1.442695, %v283_v54 }
  0xc8   : > { %v306_v7 = vmul.f32 0.00390625, %v304_v6 }
  0xca   : > { %v308_v8 = vmul.f32 %v307_v5, %v306_v7 }
  0xcc   : > { %v310_v9 = vsel %vm309_vm0, %v308_v8, 0.0 }
  0xcd   : > { %v311_v10 = vrot.slane %v310_v9, 4 }
  0xcf   : > { %v312_v11 = vadd.f32 %v311_v10, %v310_v9 }
  0xd1   : > { %v313_v12 = vrot.slane %v312_v11, 2 }
  0xd3   : > { %v314_v14 = vadd.f32 %v313_v12, %v312_v11 }
  0xd5   : > { %v315_v15 = vrot.slane %v314_v14, 1 }
  0xd7   : > { %v316_v18 = vadd.f32 %v315_v15, %v314_v14 }
  0xd9   : > { %v318_v19 = vadd.f32 %v317_v17, %v316_v18 }
  0xdb   : > { %v319_v21 = vmax.f32 %v318_v19, 0.0 }
  0xdd   : > { %v323_v22 = vrot.slane %v319_v21, %v322_v20 }
  0xdf   : > { %325 = vbcast.lane.b32.xlu0 %v323_v22, 256 }
 0x151   : > { %v326_v24 = vpop.permute.xlu0 %325 }
 0x152   : > { %v328_v25 = vmul.f32 %v327_v23, %v326_v24 }
 0x154   : > { %v330_v26 = vsel %vm329_vm1, %v328_v25, 0.0 }
 0x155   : > { %v331_v27 = vrot.slane %v330_v26, 4 }
 0x157   : > { %v332_v28 = vadd.f32 %v331_v27, %v330_v26 }
 0x159   : > { %v333_v29 = vrot.slane %v332_v28, 2 }
 0x15b   : > { %v334_v30 = vadd.f32 %v333_v29, %v332_v28 }
 0x15d   : > { %v335_v31 = vrot.slane %v334_v30, 1 }
 0x15f   : > { %v336_v33 = vadd.f32 %v335_v31, %v334_v30 }
 0x161   : > { %v338_v34 = vadd.f32 %v337_v32, %v336_v33 }
 0x163   : > { %v454_v35 = vmul.f32 -1.442695, %v338_v34 }
 0x165   : > { %511 = vpow2.f32 %v454_v35 }
 0x16f   : > { %v512_v36 = vpop.eup %511 }
 0x170   : > { %v342_v37 = vadd.f32 1.0, %v512_v36 }
 0x172   : > { %513 = vrcp.f32 %v342_v37 }
 0x173   : > { %515 = vpow2.f32 %v453_v55 }
 0x174   : > { %517 = vpow2.f32 %v452_v56 }
 0x17c   : > { %v514_v38 = vpop.eup %513 }
 0x17d   : > { %v348_v39 = vrot.slane %v514_v38, %v322_v20  ;;  %v516_v57 = vpop.eup %515 }
 0x17e   : > { %v518_v58 = vpop.eup %517  ;;  %v297_v59 = vadd.f32 1.0, %v516_v57 }
 0x17f   : > { %350 = vbcast.lane.b32.xlu1 %v348_v39, 256  ;;  %v296_v60 = vadd.f32 1.0, %v518_v58 }
 0x180   : > { %519 = vrcp.f32 %v297_v59 }
 0x181   : > { %521 = vrcp.f32 %v296_v60 }
 0x18a   : > { %v520_v61 = vpop.eup %519 }
 0x18b   : > { %v522_v62 = vpop.eup %521 }
 0x1f1   : > { %v351_v63 = vpop.permute.xlu1 %350 }
 0x1f2   : > { %v352_v2 = vadd.f32 %v522_v62, %v351_v63  ;;  %v353_v3 = vadd.f32 %v520_v61, %v351_v63 }
 0x1f4   : > { %v354_v4 = vmul.f32 %v352_v2, %v774_v0  ;;  %v355_v5 = vmul.f32 %v353_v3, %v776_v1 }
 0x1f6   : > { %356 = vst [vmem:[%s267_s29] sm:$0xff] %v354_v4  ;;  %357 = vst [vmem:[%s267_s29 + $0x8] sm:$0xff] %v355_v5 }
 0x1f7   : > { %566 = shalt.err (!%p563_p4)
}
 0x1f8   : > { %s567_s26 = scalar_lea.hbm %s805_s20, 256  ;;  %s571_s14 = scalar_lea.hbm %s855_s6, 512 }
 0x1f9   : > { %p568_p5 = scmp.ne.s32.totalorder %s805_s20, %s567_s26  ;;  %p572_p0 = scmp.lt.u32.totalorder %s805_s20, %s855_s6 }
 0x1fa   : > { %p573_p1 = scmp.lt.u32.totalorder %s571_s14, %s567_s26  ;;  %p575_p6 = scmp.lt.u32.totalorder %s567_s26, %s805_s20 }
 0x1fb   : > { %p569_p8 = pnand %p568_p5, %p864_p11 }
 0x1fc   : > { %p574_p3 = por %p573_p1, %p572_p0 }
 0x1fd   : > { %p570_p9 = pneg %p569_p8 }
 0x1fe   : > { %p576_p12 = por %p575_p6, %p574_p3 }
 0x200   : > { %p577_p13 = pnand %p576_p12, %p570_p9 }
 0x202   : > { %580 = shalt.err (!%p577_p13)
}
 0x203   : > { %464 = dma.vmem_to_hbm [thread:$0]  (%p864_p11), %s807_s19, 256, %s805_s20, %s359_s25  }
 0x204 PF: > { %s385_s29 = sand.u32 1, %s607_s21   ;;  %p865_p7 = scmp.ne.s32.totalorder %s860_s10, 0 }
 0x205   : > { %p866_p10 = scmp.ge.s32.totalorder %s619_s24, 2  ;;  %s386_s16 = scalar_lea.sflag [#allocation4], %s385_s29 }
 0x207   : > { %p471_p2 = pnand %p866_p10, %p865_p7 }
 0x209   : > { %602 = dma.done.wait (!%p471_p2), %s386_s16, 256  }
 0x20a   : > { %604 = vsyncadd (!%p471_p2), %s386_s16, 4294967040  ;;  %p19_p4 = scmp.ge.s32.totalorder %s684_s27, 4   ;;  %s867_s21 = smov %s611_s22 }
 0x20b   : > { %s868_s22 = smov %s615_s23  ;;  %s869_s23 = smov %s696_s30 }
 0x20c   : > { %s870_s24 = smov %s684_s27  ;;  %21 = sbr.rel (!%p19_p4) target bundleno = 5 (0x5), region = 89 }
 0x213   :  { %391 = vsyncpa [#allocation3], 1 }
 0x214   :  { %393 = vsyncpa [#allocation3 + $0x1], 1 }
 0x215   :  { %394 = vsyncpa [#allocation4], 1 }
 0x216   :  { %396 = vsyncpa [#allocation4 + $0x1], 1 }

</bundles_post_ra>
